<compile_context>
chip_gen: v5e
topology: v5e:2x2
jax: 0.10.0
libtpu: 0.0.40
codegen_flags: <defaults>
</compile_context>

<pallas_src>
import functools

import jax
import jax.numpy as jnp
from jax.experimental import pallas as pl
from jax.experimental.pallas import tpu as pltpu

HIDDEN = 64
_LANE = 128
_MIN_MEGACORE_TILE = 512   # only split a single big tile in two if halves stay >= this


def _round_up(x, m):
    return ((x + m - 1) // m) * m


def critic_kernel(obs_ref, acts_ref,
                  w1_ref, b1_ref,
                  w2_ref, b2_ref,
                  w3_ref, b3_ref,
                  w4_ref, b4_ref,
                  out_ref, *, obs_dim, act_dim):
    obs = obs_ref[...]
    acts = acts_ref[...]
    wdt = w2_ref.dtype  # weight storage dtype (f32 or bf16)

    # FC1 over the virtual concatenation [obs, acts]. Static ref slices are
    # zero-cost (no per-call HBM copy, unlike slicing/concat in the wrapper).
    w1o = w1_ref[:obs_dim, :]                       # (obs_dim, 64)
    w1a = w1_ref[obs_dim:obs_dim + act_dim, :]      # (act_dim, 64)
    h1 = (jnp.dot(obs, w1o, preferred_element_type=jnp.float32)
          + jnp.dot(acts, w1a, preferred_element_type=jnp.float32)
          + b1_ref[...].astype(jnp.float32))
    h1 = jnp.maximum(h1, 0.0)                       # f32 epilogue (v5e-safe)

    # FC2 (cast activations to the weight dtype -> native bf16 MXU path when
    # streaming bf16; a no-op when everything is f32).
    h2 = (jnp.dot(h1.astype(wdt), w2_ref[...], preferred_element_type=jnp.float32)
          + b2_ref[...].astype(jnp.float32))
    h2 = jnp.maximum(h2, 0.0)

    # FC3
    h3 = (jnp.dot(h2.astype(wdt), w3_ref[...], preferred_element_type=jnp.float32)
          + b3_ref[...].astype(jnp.float32))
    h3 = jnp.maximum(h3, 0.0)

    # FC4 (64 -> 1): VPU multiply + cross-lane reduce instead of an MXU push
    # that would produce only 1 useful lane out of 128.
    out = (jnp.sum(h3 * w4_ref[...].astype(jnp.float32), axis=1, keepdims=True)
           + b4_ref[...].astype(jnp.float32))
    out_ref[...] = out.astype(out_ref.dtype)
    # TODO(synk): if profiling ever shows the (TB,1) masked stores exposed,
    # re-layout the output lane-dense ((grid, TB) blocks) — secondary here.


def _vmem_limit_bytes(TB, obs_dim, act_dim, in_itemsize):
    """Explicit VMEM budget (lane-padded) with 2x headroom, clamped to a range
    that is safe on every generation (v5e 128 MiB / v6e 128 MiB / v7x 64 MiB
    physical; scoped defaults are only 16/32/32 MiB)."""
    def pad_lane(n):
        return _round_up(n, _LANE)
    in_dim = obs_dim + act_dim
    stream = 2 * TB * (pad_lane(obs_dim) + pad_lane(act_dim)) * in_itemsize  # dbl-buffered inputs
    stream += 2 * TB * _LANE * 4                                             # (TB,1) f32 out tile
    weights = 2 * 4 * (in_dim * pad_lane(HIDDEN) + 2 * HIDDEN * pad_lane(HIDDEN)
                       + 4 * pad_lane(HIDDEN) + _LANE)
    interm = 4 * TB * pad_lane(HIDDEN) * 4                                   # h1/h2/h3 + temps (f32)
    est = stream + weights + interm
    return int(min(max(2 * est, 16 * 1024 * 1024), 48 * 1024 * 1024))


def critic_forward(obs, acts, params, *, tb=2048):
    """obs: (B, n_agent*dim_observation), acts: (B, n_agent*dim_action) -> (B, 1)."""
    B, obs_dim = obs.shape
    act_dim = acts.shape[1]
    in_dim = obs_dim + act_dim

    # --- batch tile selection -------------------------------------------
    # Big tiles (default 2048 rows) amortize the ~0.35 us per-grid-step
    # overhead that dominates this tiny-feature workload.
    TB = min(tb, _round_up(B, 8))
    # Keep >= 2 grid steps when the batch is big enough to split, so the
    # "parallel" batch axis can shard across v7x's two TensorCores.
    if pl.cdiv(B, TB) < 2 and B >= 2 * _MIN_MEGACORE_TILE:
        TB = _round_up(pl.cdiv(B, 2), 8)

    # No jnp.pad: ragged final tile handled by Pallas boundary masking
    # (rows are independent; out-of-bounds writes are dropped).
    grid = (pl.cdiv(B, TB),)

    w1, b1 = params["w1"], params["b1"]   # (in_dim, 64), (1, 64)
    w2, b2 = params["w2"], params["b2"]   # (64, 64),    (1, 64)
    w3, b3 = params["w3"], params["b3"]   # (64, 64),    (1, 64)
    w4, b4 = params["w4"], params["b4"]   # (1, 64),     (1, 1)

    def batch_spec(feat):
        return pl.BlockSpec((TB, feat), lambda i: (i, 0))

    def resident_spec(rows, cols):
        # Same block for every grid step -> stays VMEM-resident (no re-DMA).
        return pl.BlockSpec((rows, cols), lambda i: (0, 0))

    in_itemsize = max(jnp.dtype(obs.dtype).itemsize, jnp.dtype(acts.dtype).itemsize)
    w_itemsize = jnp.dtype(w1.dtype).itemsize

    flops = 2 * B * (in_dim * HIDDEN + 2 * HIDDEN * HIDDEN + HIDDEN)
    bytes_accessed = (in_itemsize * B * in_dim + 4 * B
                      + w_itemsize * (in_dim * HIDDEN + 2 * HIDDEN * HIDDEN
                                      + 4 * HIDDEN + 1))

    out = pl.pallas_call(
        functools.partial(critic_kernel, obs_dim=obs_dim, act_dim=act_dim),
        out_shape=jax.ShapeDtypeStruct((B, 1), jnp.float32),
        grid=grid,
        in_specs=[
            batch_spec(obs_dim),                 # obs   (streamed, double-buffered)
            batch_spec(act_dim),                 # acts  (streamed, double-buffered)
            resident_spec(in_dim, HIDDEN),       # w1
            resident_spec(1, HIDDEN),            # b1
            resident_spec(HIDDEN, HIDDEN),       # w2
            resident_spec(1, HIDDEN),            # b2
            resident_spec(HIDDEN, HIDDEN),       # w3
            resident_spec(1, HIDDEN),            # b3
            resident_spec(1, HIDDEN),            # w4 (row form)
            resident_spec(1, 1),                 # b4
        ],
        out_specs=pl.BlockSpec((TB, 1), lambda i: (i, 0)),
        compiler_params=pltpu.CompilerParams(
            dimension_semantics=("parallel",),
            vmem_limit_bytes=_vmem_limit_bytes(TB, obs_dim, act_dim, in_itemsize)),
        cost_estimate=pl.CostEstimate(
            flops=flops, transcendentals=0, bytes_accessed=bytes_accessed),
    )(obs, acts, w1, b1, w2, b2, w3, b3, w4, b4)

    return out


def init_params(key, obs_dim, act_dim, dtype=jnp.float32):
    """PyTorch nn.Linear-style init (U[-1/sqrt(fan_in), 1/sqrt(fan_in)]).

    Params are stored ONCE in kernel-ready layout (no per-call reshapes):
      w1, w2, w3 : (in_features, out_features)   -> kernel computes x @ W
      w4         : (1, 64) row
      b1..b3     : (1, 64) rows,  b4: (1, 1)
    `dtype=jnp.bfloat16` halves HBM streaming bytes; dots still accumulate f32.
    """
    def linear(k, fan_in, fan_out):
        kw, kb = jax.random.split(k)
        bound = 1.0 / (fan_in ** 0.5)
        w = jax.random.uniform(kw, (fan_in, fan_out), jnp.float32,
                               minval=-bound, maxval=bound)
        b = jax.random.uniform(kb, (1, fan_out), jnp.float32,
                               minval=-bound, maxval=bound)
        return w.astype(dtype), b.astype(dtype)

    k1, k2, k3, k4 = jax.random.split(key, 4)
    params = {}
    params["w1"], params["b1"] = linear(k1, obs_dim + act_dim, HIDDEN)
    params["w2"], params["b2"] = linear(k2, HIDDEN, HIDDEN)
    params["w3"], params["b3"] = linear(k3, HIDDEN, HIDDEN)
    w4, b4 = linear(k4, HIDDEN, 1)
    params["w4"] = w4.T            # (1, 64) row
    params["b4"] = b4              # (1, 1)
    return params


def critic_ref(obs, acts, params):
    """Pure-JAX f32 reference for correctness checking."""
    f = lambda a: a.astype(jnp.float32)
    x = jnp.concatenate([f(obs), f(acts)], axis=1)
    h = jnp.maximum(x @ f(params["w1"]) + f(params["b1"]), 0.0)
    h = jnp.maximum(h @ f(params["w2"]) + f(params["b2"]), 0.0)
    h = jnp.maximum(h @ f(params["w3"]) + f(params["b3"]), 0.0)
    return h @ f(params["w4"]).T + f(params["b4"])


if __name__ == "__main__":
    # Small, module-consistent shapes.
    n_agent = 2
    dim_observation = 16
    dim_action = 8

    obs_dim = n_agent * dim_observation   # 32
    act_dim = n_agent * dim_action        # 16

    key = jax.random.PRNGKey(0)
    k_par, k1, k2, k3, k4, k5, k6 = jax.random.split(key, 7)

    params = init_params(k_par, obs_dim, act_dim)

    # Test 1: tiny batch (single grid step, B=4 < TB=8 partial block, no pad).
    B1 = 4
    obs1 = jax.random.normal(k1, (B1, obs_dim), jnp.float32)
    acts1 = jax.random.normal(k2, (B1, act_dim), jnp.float32)
    out1 = jax.block_until_ready(critic_forward(obs1, acts1, params))
    ref1 = critic_ref(obs1, acts1, params)
    assert out1.shape == (B1, 1)
    assert jnp.allclose(out1, ref1, atol=1e-5, rtol=1e-5), (out1, ref1)

    # Test 2: ragged multi-step grid (B=300, TB=128 -> 3 steps, partial tail,
    # handled by boundary masking instead of a wrapper-side pad copy).
    B2 = 300
    obs2 = jax.random.normal(k3, (B2, obs_dim), jnp.float32)
    acts2 = jax.random.normal(k4, (B2, act_dim), jnp.float32)
    out2 = jax.block_until_ready(critic_forward(obs2, acts2, params, tb=128))
    ref2 = critic_ref(obs2, acts2, params)
    assert out2.shape == (B2, 1)
    assert jnp.allclose(out2, ref2, atol=1e-4, rtol=1e-4)

    # Test 3: default big-tile path with the megacore split (B=1200 -> TB=600,
    # grid=2 so the parallel batch axis can use both v7x TensorCores).
    B3 = 1200
    obs3 = jax.random.normal(k5, (B3, obs_dim), jnp.float32)
    acts3 = jax.random.normal(k6, (B3, act_dim), jnp.float32)
    out3 = jax.block_until_ready(critic_forward(obs3, acts3, params))
    ref3 = critic_ref(obs3, acts3, params)
    assert out3.shape == (B3, 1)
    assert jnp.allclose(out3, ref3, atol=1e-4, rtol=1e-4)

    # Test 4: bf16 streaming (halved HBM bytes, f32 accumulation/epilogue).
    params_bf16 = init_params(k_par, obs_dim, act_dim, dtype=jnp.bfloat16)
    obs4 = obs2.astype(jnp.bfloat16)
    acts4 = acts2.astype(jnp.bfloat16)
    out4 = jax.block_until_ready(critic_forward(obs4, acts4, params_bf16, tb=128))
    ref4 = critic_ref(obs4, acts4, params_bf16)
    assert out4.shape == (B2, 1)
    assert out4.dtype == jnp.float32
    assert jnp.allclose(out4, ref4, atol=7.5e-2, rtol=7.5e-2)

    print("KERNEL_OK")
</pallas_src>

<mosaic_0001>
module attributes {stable_mosaic.version = 11 : i64} {
  func.func @critic_kernel(%arg0: i32, %arg1: memref<8x32xf32, #tpu.memory_space<vmem>>, %arg2: memref<8x16xf32, #tpu.memory_space<vmem>>, %arg3: memref<48x64xf32, #tpu.memory_space<vmem>>, %arg4: memref<1x64xf32, #tpu.memory_space<vmem>>, %arg5: memref<64x64xf32, #tpu.memory_space<vmem>>, %arg6: memref<1x64xf32, #tpu.memory_space<vmem>>, %arg7: memref<64x64xf32, #tpu.memory_space<vmem>>, %arg8: memref<1x64xf32, #tpu.memory_space<vmem>>, %arg9: memref<1x64xf32, #tpu.memory_space<vmem>>, %arg10: memref<1x1xf32, #tpu.memory_space<vmem>>, %arg11: memref<8x1xf32, #tpu.memory_space<vmem>>) attributes {dimension_semantics = [#tpu.dimension_semantics<parallel>], iteration_bounds = array<i64: 1>, scalar_prefetch = 0 : i64, scratch_operands = 0 : i64, tpu.core_type = #tpu.core_type<tc>, window_params = [{transform_indices = @transform_0, window_bounds = array<i64: 8, 32>}, {transform_indices = @transform_1, window_bounds = array<i64: 8, 16>}, {pipeline_mode = #tpu.pipeline_mode<synchronous>, transform_indices = @transform_2, window_bounds = array<i64: 48, 64>}, {pipeline_mode = #tpu.pipeline_mode<synchronous>, transform_indices = @transform_3, window_bounds = array<i64: 1, 64>}, {pipeline_mode = #tpu.pipeline_mode<synchronous>, transform_indices = @transform_4, window_bounds = array<i64: 64, 64>}, {pipeline_mode = #tpu.pipeline_mode<synchronous>, transform_indices = @transform_5, window_bounds = array<i64: 1, 64>}, {pipeline_mode = #tpu.pipeline_mode<synchronous>, transform_indices = @transform_6, window_bounds = array<i64: 64, 64>}, {pipeline_mode = #tpu.pipeline_mode<synchronous>, transform_indices = @transform_7, window_bounds = array<i64: 1, 64>}, {pipeline_mode = #tpu.pipeline_mode<synchronous>, transform_indices = @transform_8, window_bounds = array<i64: 1, 64>}, {pipeline_mode = #tpu.pipeline_mode<synchronous>, transform_indices = @transform_9, window_bounds = array<i64: 1, 1>}, {transform_indices = @transform_10, window_bounds = array<i64: 8, 1>}]} {
    %c0 = arith.constant 0 : index
    %c0_0 = arith.constant 0 : index
    %0 = vector.load %arg1[%c0, %c0_0] : memref<8x32xf32, #tpu.memory_space<vmem>>, vector<8x32xf32>
    %c0_1 = arith.constant 0 : index
    %c0_2 = arith.constant 0 : index
    %1 = vector.load %arg2[%c0_1, %c0_2] : memref<8x16xf32, #tpu.memory_space<vmem>>, vector<8x16xf32>
    %c0_3 = arith.constant 0 : index
    %c0_4 = arith.constant 0 : index
    %2 = vector.load %arg3[%c0_3, %c0_4] : memref<48x64xf32, #tpu.memory_space<vmem>>, vector<32x64xf32>
    %c32 = arith.constant 32 : index
    %c0_5 = arith.constant 0 : index
    %3 = vector.load %arg3[%c32, %c0_5] : memref<48x64xf32, #tpu.memory_space<vmem>>, vector<16x64xf32>
    %cst = arith.constant dense<0.000000e+00> : vector<8x64xf32>
    %4 = tpu.matmul %0, %2, %cst {dimension_numbers = #tpu.dot_dimension_numbers<[1], [0], [0], [1], [0, 0, 1, 1], [], []>} : vector<8x32xf32>, vector<32x64xf32>, vector<8x64xf32> -> vector<8x64xf32>
    %cst_6 = arith.constant dense<0.000000e+00> : vector<8x64xf32>
    %5 = tpu.matmul %1, %3, %cst_6 {dimension_numbers = #tpu.dot_dimension_numbers<[1], [0], [0], [1], [0, 0, 1, 1], [], []>} : vector<8x16xf32>, vector<16x64xf32>, vector<8x64xf32> -> vector<8x64xf32>
    %6 = arith.addf %4, %5 : vector<8x64xf32>
    %c0_7 = arith.constant 0 : index
    %c0_8 = arith.constant 0 : index
    %7 = vector.load %arg4[%c0_7, %c0_8] : memref<1x64xf32, #tpu.memory_space<vmem>>, vector<1x64xf32>
    %8 = vector.broadcast %7 : vector<1x64xf32> to vector<8x64xf32>
    %9 = arith.addf %6, %8 : vector<8x64xf32>
    %cst_9 = arith.constant 0.000000e+00 : f32
    %10 = vector.broadcast %cst_9 : f32 to vector<8x64xf32>
    %11 = arith.maximumf %9, %10 : vector<8x64xf32>
    %c0_10 = arith.constant 0 : index
    %c0_11 = arith.constant 0 : index
    %12 = vector.load %arg5[%c0_10, %c0_11] : memref<64x64xf32, #tpu.memory_space<vmem>>, vector<64x64xf32>
    %cst_12 = arith.constant dense<0.000000e+00> : vector<8x64xf32>
    %13 = tpu.matmul %11, %12, %cst_12 {dimension_numbers = #tpu.dot_dimension_numbers<[1], [0], [0], [1], [0, 0, 1, 1], [], []>} : vector<8x64xf32>, vector<64x64xf32>, vector<8x64xf32> -> vector<8x64xf32>
    %c0_13 = arith.constant 0 : index
    %c0_14 = arith.constant 0 : index
    %14 = vector.load %arg6[%c0_13, %c0_14] : memref<1x64xf32, #tpu.memory_space<vmem>>, vector<1x64xf32>
    %15 = vector.broadcast %14 : vector<1x64xf32> to vector<8x64xf32>
    %16 = arith.addf %13, %15 : vector<8x64xf32>
    %cst_15 = arith.constant 0.000000e+00 : f32
    %17 = vector.broadcast %cst_15 : f32 to vector<8x64xf32>
    %18 = arith.maximumf %16, %17 : vector<8x64xf32>
    %c0_16 = arith.constant 0 : index
    %c0_17 = arith.constant 0 : index
    %19 = vector.load %arg7[%c0_16, %c0_17] : memref<64x64xf32, #tpu.memory_space<vmem>>, vector<64x64xf32>
    %cst_18 = arith.constant dense<0.000000e+00> : vector<8x64xf32>
    %20 = tpu.matmul %18, %19, %cst_18 {dimension_numbers = #tpu.dot_dimension_numbers<[1], [0], [0], [1], [0, 0, 1, 1], [], []>} : vector<8x64xf32>, vector<64x64xf32>, vector<8x64xf32> -> vector<8x64xf32>
    %c0_19 = arith.constant 0 : index
    %c0_20 = arith.constant 0 : index
    %21 = vector.load %arg8[%c0_19, %c0_20] : memref<1x64xf32, #tpu.memory_space<vmem>>, vector<1x64xf32>
    %22 = vector.broadcast %21 : vector<1x64xf32> to vector<8x64xf32>
    %23 = arith.addf %20, %22 : vector<8x64xf32>
    %cst_21 = arith.constant 0.000000e+00 : f32
    %24 = vector.broadcast %cst_21 : f32 to vector<8x64xf32>
    %25 = arith.maximumf %23, %24 : vector<8x64xf32>
    %c0_22 = arith.constant 0 : index
    %c0_23 = arith.constant 0 : index
    %26 = vector.load %arg9[%c0_22, %c0_23] : memref<1x64xf32, #tpu.memory_space<vmem>>, vector<1x64xf32>
    %27 = vector.broadcast %26 : vector<1x64xf32> to vector<8x64xf32>
    %28 = arith.mulf %25, %27 : vector<8x64xf32>
    %cst_24 = arith.constant dense<0.000000e+00> : vector<8xf32>
    %29 = vector.multi_reduction <add>, %28, %cst_24 [1] : vector<8x64xf32> to vector<8xf32>
    %30 = vector.shape_cast %29 : vector<8xf32> to vector<8x1xf32>
    %c0_25 = arith.constant 0 : index
    %c0_26 = arith.constant 0 : index
    %31 = vector.load %arg10[%c0_25, %c0_26] : memref<1x1xf32, #tpu.memory_space<vmem>>, vector<1x1xf32>
    %32 = vector.broadcast %31 : vector<1x1xf32> to vector<8x1xf32>
    %33 = arith.addf %30, %32 : vector<8x1xf32>
    %c0_27 = arith.constant 0 : index
    %c0_28 = arith.constant 0 : index
    %34 = vector.load %arg11[%c0_27, %c0_28] : memref<8x1xf32, #tpu.memory_space<vmem>>, vector<8x1xf32>
    tpu.vector_store %arg11[%c0_27, %c0_28], %33 {strides = array<i32>} : memref<8x1xf32, #tpu.memory_space<vmem>>, vector<8x1xf32>,
    return
  }
  func.func @transform_0(%arg0: i32) -> (i32, i32) {
    %c0_i32 = arith.constant 0 : i32
    %c0_i32_0 = arith.constant 0 : i32
    return %arg0, %c0_i32 : i32, i32
  }
  func.func @transform_1(%arg0: i32) -> (i32, i32) {
    %c0_i32 = arith.constant 0 : i32
    %c0_i32_0 = arith.constant 0 : i32
    return %arg0, %c0_i32 : i32, i32
  }
  func.func @transform_2(%arg0: i32) -> (i32, i32) {
    %c0_i32 = arith.constant 0 : i32
    %c0_i32_0 = arith.constant 0 : i32
    %c0_i32_1 = arith.constant 0 : i32
    return %c0_i32, %c0_i32_0 : i32, i32
  }
  func.func @transform_3(%arg0: i32) -> (i32, i32) {
    %c0_i32 = arith.constant 0 : i32
    %c0_i32_0 = arith.constant 0 : i32
    %c0_i32_1 = arith.constant 0 : i32
    return %c0_i32, %c0_i32_0 : i32, i32
  }
  func.func @transform_4(%arg0: i32) -> (i32, i32) {
    %c0_i32 = arith.constant 0 : i32
    %c0_i32_0 = arith.constant 0 : i32
    %c0_i32_1 = arith.constant 0 : i32
    return %c0_i32, %c0_i32_0 : i32, i32
  }
  func.func @transform_5(%arg0: i32) -> (i32, i32) {
    %c0_i32 = arith.constant 0 : i32
    %c0_i32_0 = arith.constant 0 : i32
    %c0_i32_1 = arith.constant 0 : i32
    return %c0_i32, %c0_i32_0 : i32, i32
  }
  func.func @transform_6(%arg0: i32) -> (i32, i32) {
    %c0_i32 = arith.constant 0 : i32
    %c0_i32_0 = arith.constant 0 : i32
    %c0_i32_1 = arith.constant 0 : i32
    return %c0_i32, %c0_i32_0 : i32, i32
  }
  func.func @transform_7(%arg0: i32) -> (i32, i32) {
    %c0_i32 = arith.constant 0 : i32
    %c0_i32_0 = arith.constant 0 : i32
    %c0_i32_1 = arith.constant 0 : i32
    return %c0_i32, %c0_i32_0 : i32, i32
  }
  func.func @transform_8(%arg0: i32) -> (i32, i32) {
    %c0_i32 = arith.constant 0 : i32
    %c0_i32_0 = arith.constant 0 : i32
    %c0_i32_1 = arith.constant 0 : i32
    return %c0_i32, %c0_i32_0 : i32, i32
  }
  func.func @transform_9(%arg0: i32) -> (i32, i32) {
    %c0_i32 = arith.constant 0 : i32
    %c0_i32_0 = arith.constant 0 : i32
    %c0_i32_1 = arith.constant 0 : i32
    return %c0_i32, %c0_i32_0 : i32, i32
  }
  func.func @transform_10(%arg0: i32) -> (i32, i32) {
    %c0_i32 = arith.constant 0 : i32
    %c0_i32_0 = arith.constant 0 : i32
    return %arg0, %c0_i32 : i32, i32
  }
}

</mosaic_0001>

<bundles_post_ra>
// kernel: tpu_custom_call.1
= control target key start
LH: loop header
LB: loop body
LE: loop exit
PB: predicated region body
PF: predicated region fallthrough
CT: control target
= control target key end

     0   :  { %s553_s0 = inlined_call_operand.hbm [shape: f32[4,32], index: 0, kind: input, shape index: {}]   ;;  %s554_s1 = inlined_call_operand.hbm [shape: f32[4,16], index: 1, kind: input, shape index: {}]   ;;  %s555_s2 = inlined_call_operand.hbm [shape: f32[48,64], index: 2, kind: input, shape index: {}]   ;;  %s556_s3 = inlined_call_operand.vmem [shape: f32[1,64], index: 3, kind: input, shape index: {}]   ;;  %s557_s4 = inlined_call_operand.hbm [shape: f32[64,64], index: 4, kind: input, shape index: {}]   ;;  %s558_s5 = inlined_call_operand.vmem [shape: f32[1,64], index: 5, kind: input, shape index: {}]   ;;  %s559_s6 = inlined_call_operand.hbm [shape: f32[64,64], index: 6, kind: input, shape index: {}]   ;;  %s560_s7 = inlined_call_operand.vmem [shape: f32[1,64], index: 7, kind: input, shape index: {}]   ;;  %s561_s8 = inlined_call_operand.vmem [shape: f32[1,64], index: 8, kind: input, shape index: {}]   ;;  %s562_s9 = inlined_call_operand.<no memory space> [shape: f32[1,1], index: 9, kind: input, shape index: {}]   ;;  %s563_s10 = inlined_call_operand.vmem [shape: f32[4,1], index: 10, kind: output, shape index: {}]  }
   0x1   :  { %v15_v0 = vstv %s562_s9 }
   0x2   :  { %16 = vst [vmem:[#allocation2] sm:$0x1] %v15_v0 }
   0x3   :  { %17 = vsyncpa [#allocation4], 0 }
   0x4   :  { %18 = vsyncpa [#allocation6], 0 }
   0x5   :  { %19 = vsyncpa [#allocation9], 0 }
   0x6   :  { %23 = vsyncadd [#allocation4], 64  ;;  %s24_s17 = sshll.u32 %s553_s0, 4  ;;  %s453_s18 = smov [#allocation3]   ;;  %s25_s17 = int_to_ptr.hbm [resolvable:$true] %s24_s17 }
   0x7   :  { %s26_s19 = sshll.u32 %s453_s18, 4  ;;  %s454_s20 = smov 64   ;;  %s27_s19 = int_to_ptr.vmem [resolvable:$true] %s26_s19 }
   0x8   :  { %s455_s21 = smov 4  }
   0x9   :  { %32 = dma.hbm_to_vmem [thread:$0]  %s25_s17, 64, %s27_s19, [#allocation4], %s454_s20, %s454_s20, %s455_s21  }
   0xa   :  { %36 = vsyncadd [#allocation6], 64  ;;  %s37_s9 = sshll.u32 %s554_s1, 4  ;;  %s456_s24 = smov [#allocation5]   ;;  %s38_s9 = int_to_ptr.hbm [resolvable:$true] %s37_s9 }
   0xb   :  { %s39_s25 = sshll.u32 %s456_s24, 4  ;;  %s65_s0 = sshll.u32 %s557_s4, 4  ;;  %s40_s25 = int_to_ptr.vmem [resolvable:$true] %s39_s25  ;;  %s66_s0 = int_to_ptr.hbm [resolvable:$true] %s65_s0 }
   0xc   :  { %45 = dma.hbm_to_vmem [thread:$0]  %s38_s9, 64, %s40_s25, [#allocation6], %s454_s20, %s454_s20, %s455_s21  }
   0xd   :  { %s457_s28 = smov [#allocation8]   ;;  %s50_s12 = sshll.u32 %s555_s2, 4  ;;  %s51_s12 = int_to_ptr.hbm [resolvable:$true] %s50_s12 }
   0xe   :  { %s67_s29 = sshll.u32 %s457_s28, 4  ;;  %s458_s13 = smov 128   ;;  %s68_s29 = int_to_ptr.vmem [resolvable:$true] %s67_s29 }
   0xf   :  { %s459_s1 = smov 8   ;;  %s80_s16 = sshll.u32 %s559_s6, 4  ;;  %s81_s16 = int_to_ptr.hbm [resolvable:$true] %s80_s16 }
  0x10   :  { %73 = dma.hbm_to_vmem [thread:$0]  %s66_s0, 1024, %s68_s29, [#allocation9], %s458_s13, %s458_s13, %s459_s1  }
  0x11   :  { %s460_s17 = smov [#allocation7]   ;;  %s461_s4 = smov [#allocation10]  }
  0x12   :  { %s52_s18 = sshll.u32 %s460_s17, 4  ;;  %s82_s19 = sshll.u32 %s461_s4, 4  ;;  %s53_s18 = int_to_ptr.vmem [resolvable:$true] %s52_s18  ;;  %s83_s19 = int_to_ptr.vmem [resolvable:$true] %s82_s19 }
  0x13   :  { %58 = dma.hbm_to_vmem [thread:$0]  %s51_s12, 768, %s53_s18, [#allocation6], %s458_s13, %s458_s13, %s459_s1  }
  0x14   :  { %88 = dma.hbm_to_vmem [thread:$0]  %s81_s16, 1024, %s83_s19, [#allocation9], %s458_s13, %s458_s13, %s459_s1  }
  0x15   :  { %447 = dma.done.wait [#allocation4], 128  }
  0x16   :  { %448 = vsyncadd [#allocation4], 4294967168 }
  0x17   :  { %449 = dma.done.wait [#allocation6], 896  }
  0x18   :  { %450 = vsyncadd [#allocation6], 4294966400 }
  0x19   :  { %451 = dma.done.wait [#allocation9], 2048  }
  0x1a   :  { %452 = vsyncadd [#allocation9], 4294965248  ;;  %v120_v1 = vld [vmem:[#allocation7 + $0x18] sm:$0xff]  ;;  %v119_v2 = vld [vmem:[#allocation7 + $0x10] sm:$0xff]  ;;  %vm123_vm0 = vcmask 130048   ;;  %vm147_vm1 = vcmask 261120  }
  0x1b   :  { %v122_v3 = vld [vmem:[#allocation7 + $0x28] sm:$0xff]  ;;  %163 = vmatpush.msra.mxu1 %v120_v1  ;;  %v121_v4 = vld [vmem:[#allocation7 + $0x20] sm:$0xff]  ;;  %v116_v6 = vld [vmem:[#allocation5] sm:$0xff]  ;;  %vm189_vm2 = vcmask 523264   ;;  %vm263_vm3 = vcmask 7168  }
  0x1c   :  { %141 = vmatpush.msra.mxu0 %v122_v3  ;;  %v118_v5 = vld [vmem:[#allocation7 + $0x8] sm:$0xff]  ;;  %v117_v8 = vld [vmem:[#allocation7] sm:$0xff]  ;;  %v115_v9 = vld [vmem:[#allocation3] sm:$0xff] }
  0x1d   :  { %v184_v7 = vld [vmem:[#allocation8 + $0x38] sm:$0xff]  ;;  %164 = vmatpush.msra.mxu1 %v119_v2  ;;  %v183_v10 = vld [vmem:[#allocation8 + $0x30] sm:$0xff]  ;;  %v182_v11 = vld [vmem:[#allocation8 + $0x28] sm:$0xff] }
  0x1e   :  { %142 = vmatpush.msra.mxu0 %v121_v4  ;;  %201 = vmatpush.msra.mxu2 %v184_v7  ;;  %v181_v12 = vld [vmem:[#allocation8 + $0x20] sm:$0xff]  ;;  %v180_v13 = vld [vmem:[#allocation8 + $0x18] sm:$0xff]  ;;  %v179_v14 = vld [vmem:[#allocation8 + $0x10] sm:$0xff] }
  0x1f   :  { %309 = vmatmul.msk.f32.vlgmr.msra.gmra.mxu0 %vm123_vm0, %v116_v6  ;;  %165 = vmatpush.msra.mxu1 %v118_v5  ;;  %v178_v15 = vld [vmem:[#allocation8 + $0x8] sm:$0xff]  ;;  %v177_v16 = vld [vmem:[#allocation8] sm:$0xff]  ;;  %v221_v17 = vld [vmem:[#allocation10 + $0x38] sm:$0xff] }
  0x20   :  { %202 = vmatpush.msra.mxu2 %v183_v10  ;;  %v220_v18 = vld [vmem:[#allocation10 + $0x30] sm:$0xff]  ;;  %237 = vmatpush.msra.mxu3 %v221_v17  ;;  %v219_v19 = vld [vmem:[#allocation10 + $0x28] sm:$0xff]  ;;  %v218_v20 = vld [vmem:[#allocation10 + $0x20] sm:$0xff] }
  0x21   :  { %166 = vmatpush.msra.mxu1 %v117_v8  ;;  %v217_v21 = vld [vmem:[#allocation10 + $0x18] sm:$0xff]  ;;  %v216_v28 = vld [vmem:[#allocation10 + $0x10] sm:$0xff]  ;;  %v215_v29 = vld [vmem:[#allocation10 + $0x8] sm:$0xff] }
  0x22   :  { %310 = vmatmul.msk.f32.vlgmr.msra.gmra.mxu1 %vm147_vm1, %v115_v9  ;;  %203 = vmatpush.msra.mxu2 %v182_v11  ;;  %v322_v23 = vld [vmem:[%s556_s3] ss:$0 sm:$0xff]  ;;  %v214_v30 = vld [vmem:[#allocation10] sm:$0xff] }
  0x23   :  { %238 = vmatpush.msra.mxu3 %v220_v18  ;;  %v323_v31 = vld [vmem:[%s558_s5] ss:$0 sm:$0xff] }
  0x24   :  { %204 = vmatpush.msra.mxu2 %v181_v12  ;;  %v324_v35 = vld [vmem:[%s560_s7] ss:$0 sm:$0xff] }
  0x25   :  { %239 = vmatpush.msra.mxu3 %v219_v19  ;;  %v325_v38 = vld [vmem:[%s561_s8] ss:$0 sm:$0xff] }
  0x26   :  { %205 = vmatpush.msra.mxu2 %v180_v13  ;;  %v326_v42 = vld [vmem:[#allocation2] ss:$0 sm:$0xff] }
  0x27   :  { %240 = vmatpush.msra.mxu3 %v218_v20 }
  0x28   :  { %206 = vmatpush.msra.mxu2 %v179_v14 }
  0x29   :  { %241 = vmatpush.msra.mxu3 %v217_v21 }
  0x2a   :  { %207 = vmatpush.msra.mxu2 %v178_v15 }
  0x2b   :  { %242 = vmatpush.msra.mxu3 %v216_v28 }
  0x2c   :  { %208 = vmatpush.msra.mxu2 %v177_v16 }
  0x2d   :  { %243 = vmatpush.msra.mxu3 %v215_v29 }
  0x2f   :  { %244 = vmatpush.msra.mxu3 %v214_v30 }
  0x9c   :  { %v144_v22 = vpop.f32.mrf.mxu0 }
  0x9f   :  { %v168_v24 = vpop.f32.mrf.mxu1 }
  0xa0   :  { %v169_v25 = vadd.f32 %v168_v24, %v144_v22 }
  0xa2   :  { %v175_v26 = vadd.f32 %v322_v23, %v169_v25 }
  0xa4   :  { %v176_v27 = vmax.f32 %v175_v26, 0.0 }
  0xa6   :  { %311 = vmatmul.msk.f32.vlgmr.msra.gmra.mxu2 %vm189_vm2, %v176_v27 }
 0x129   :  { %v210_v32 = vpop.f32.mrf.mxu2 }
 0x12a   :  { %v211_v33 = vadd.f32 %v323_v31, %v210_v32 }
 0x12c   :  { %v213_v34 = vmax.f32 %v211_v33, 0.0 }
 0x12e   :  { %312 = vmatmul.msk.f32.vlgmr.msra.gmra.mxu3 %vm189_vm2, %v213_v34 }
 0x1b1   :  { %v246_v36 = vpop.f32.mrf.mxu3 }
 0x1b2   :  { %v247_v37 = vadd.f32 %v324_v35, %v246_v36 }
 0x1b4   :  { %v249_v39 = vmax.f32 %v247_v37, 0.0 }
 0x1b6   :  { %v254_v40 = vmul.f32 %v325_v38, %v249_v39 }
 0x1b8   :  { %v255_v41 = vsel %vm189_vm2, %v254_v40, 0.0 }
 0x1b9   :  { %256 = vadd.xlane.f32.xlu0 %v255_v41 }
 0x22c   :  { %v257_v43 = vpop.xlane.xlu0 %256 }
 0x22d   :  { %v262_v44 = vadd.f32 %v326_v42, %v257_v43 }
 0x22f   :  { %264 = vst.msk [vmem:[#allocation11] sm:$0xff] %vm263_vm3, %v262_v44 }
 0x236   :  { %v283_v45 = vld [vmem:[#allocation11] sm:$0xf] }
 0x237   :  { %284 = vst [vmem:[%s563_s10] sm:$0xf] %v283_v45 }
 0x238   :  { %302 = vsyncpa [#allocation4], 1 }
 0x239   :  { %303 = vsyncpa [#allocation6], 1 }
 0x23a   :  { %304 = vsyncpa [#allocation9], 1 }

</bundles_post_ra>
